<compile_context>
chip_gen: v5e
topology: v5e:2x2
jax: 0.10.0
libtpu: 0.0.40
codegen_flags: <defaults>
</compile_context>

<pallas_src>
import functools
import math

import jax
import jax.numpy as jnp
from jax import lax
from jax.experimental import pallas as pl
from jax.experimental.pallas import tpu as pltpu


_NEG_BIG = -1e30        # finite causal-mask sentinel (no inf/NaN hazard)


# ----------------------------- in-kernel helpers -----------------------------

def _gelu_tanh(x):
    # matches torch.nn.GELU(approximate='tanh'); dtype-preserving (f32 or bf16)
    c = math.sqrt(2.0 / math.pi)
    return 0.5 * x * (1.0 + jnp.tanh(c * (x + 0.044715 * x * x * x)))


def _layer_norm(x, w, b, eps=1e-5):
    mu = jnp.mean(x, axis=-1, keepdims=True)
    var = jnp.mean((x - mu) ** 2, axis=-1, keepdims=True)
    return (x - mu) * lax.rsqrt(var + eps) * w + b


def _choose_tile(n, target, granule=128):
    """Largest divisor of n that is <= target and a multiple of `granule`
    (falls back to multiples of 8, then n itself)."""
    if n <= target:
        return n
    for g in (granule, 8):
        t = (target // g) * g
        while t >= g:
            if n % t == 0:
                return t
            t -= g
    return n


def _device_config():
    """Generation-specific tiling targets / VMEM budget (per perf review)."""
    try:
        kind = jax.devices()[0].device_kind.lower()
    except Exception:                                      # pragma: no cover
        kind = ""
    if "v7" in kind:     # 64 MiB VMEM, bf16 VPU/EUP, crossover ~310 flop/B
        return dict(vmem_limit=40 * 2**20, tq=384, tkv=256, gelu_bf16=True)
    if "v6" in kind:     # 128 MiB VMEM, bf16 VPU/EUP, crossover ~650 flop/B
        return dict(vmem_limit=96 * 2**20, tq=512, tkv=256, gelu_bf16=True)
    if "v5" in kind and ("lite" in kind or "v5e" in kind):
        # v5e: no bf16 VPU/EUP; attention already ~balanced at tq=256
        return dict(vmem_limit=96 * 2**20, tq=256, tkv=256, gelu_bf16=False)
    # v4 / v5p / unknown: conservative defaults
    return dict(vmem_limit=64 * 2**20, tq=256, tkv=256, gelu_bf16=False)


# --------------------- kernel 1: ln_1 + fused QKV projection ---------------------

def _ln_qkv_kernel(x_ref, ln1w_ref, ln1b_ref, w_attn_ref, b_attn_ref,
                   q_ref, k_ref, v_ref):
    x = x_ref[0]                                          # (tile, C) f32
    C = q_ref.shape[-1]
    h = _layer_norm(x, ln1w_ref[0], ln1b_ref[0])
    qkv = jnp.dot(h.astype(jnp.bfloat16), w_attn_ref[...],
                  preferred_element_type=jnp.float32) + b_attn_ref[0]   # (tile, 3C)
    # Lane-dense stores: each output slab is (tile, C) with C in the lane dim.
    # The 1/sqrt(hd) softmax scale is already folded into the Q weights/bias.
    q_ref[0] = qkv[:, :C].astype(q_ref.dtype)
    k_ref[0] = qkv[:, C:2 * C].astype(k_ref.dtype)
    v_ref[0] = qkv[:, 2 * C:].astype(v_ref.dtype)


# --------- kernel 2: flash causal attention (triangular grid) + fused c_proj ---------

def _flash_attn_kernel(qi_ref, ki_ref,                    # scalar-prefetch tables (SMEM)
                       q_ref, k_ref, v_ref, wp_ref, bp_ref,
                       o_ref, m_scr, l_scr, acc_scr, *, n_head):
    pair = pl.program_id(1)
    qi = qi_ref[pair]
    ki = ki_ref[pair]

    tq, C = q_ref.shape[1], q_ref.shape[2]
    tkv = k_ref.shape[1]
    hd = C // n_head

    @pl.when(ki == 0)
    def _init():
        m_scr[...] = jnp.full_like(m_scr, _NEG_BIG)
        l_scr[...] = jnp.zeros_like(l_scr)
        acc_scr[...] = jnp.zeros_like(acc_scr)

    q = q_ref[0]                                          # (tq, C)  bf16, pre-scaled
    k = k_ref[0]                                          # (tkv, C) bf16
    v = v_ref[0]                                          # (tkv, C) bf16

    # Additive causal mask, built once per grid step and shared across heads.
    # Interior tiles (fully below the diagonal) get an all-zero mask.
    needs_mask = ki * tkv + (tkv - 1) > qi * tq
    rel = (qi * tq - ki * tkv) + (lax.broadcasted_iota(jnp.int32, (tq, tkv), 0)
                                  - lax.broadcasted_iota(jnp.int32, (tq, tkv), 1))
    neg = jnp.where(jnp.logical_and(needs_mask, rel < 0),
                    jnp.float32(_NEG_BIG), jnp.float32(0.0))

    # NOTE: m/l scratch keep a trailing dim of 1 (lane-padded) so they broadcast
    # against (tq, tkv) scores without a lane<->sublane relayout.
    for h in range(n_head):
        sl = slice(h * hd, (h + 1) * hd)                  # static lane slice
        s = jnp.einsum("qd,kd->qk", q[:, sl], k[:, sl],
                       preferred_element_type=jnp.float32) + neg        # (tq, tkv)
        m_prev = m_scr[h]                                 # (tq, 1)
        m_new = jnp.maximum(m_prev, jnp.max(s, axis=-1, keepdims=True))
        alpha = jnp.exp(m_prev - m_new)
        prob = jnp.exp(s - m_new)
        l_scr[h] = alpha * l_scr[h] + jnp.sum(prob, axis=-1, keepdims=True)
        acc_scr[h] = alpha * acc_scr[h] + jnp.dot(
            prob.astype(jnp.bfloat16), v[:, sl], preferred_element_type=jnp.float32)
        m_scr[h] = m_new

    is_last = (ki + 1) * tkv > qi * tq + (tq - 1)

    @pl.when(is_last)
    def _finalize():
        inv_l = pl.reciprocal(l_scr[...], approx=True)    # EUP slot, ~free
        out = None
        for h in range(n_head):
            y_h = (acc_scr[h] * inv_l[h]).astype(jnp.bfloat16)          # (tq, hd)
            d = jnp.dot(y_h, wp_ref[h * hd:(h + 1) * hd, :],            # fused c_proj
                        preferred_element_type=jnp.float32)
            out = d if out is None else out + d
        o_ref[0] = (out + bp_ref[0]).astype(o_ref.dtype)  # lane-dense (tq, C) store


# ------------- kernel 3: attn residual + ln_2 + MLP(GELU tanh) + residual -------------

def _mlp_kernel(x_ref, y_ref, ln2w_ref, ln2b_ref, w_fc_ref, b_fc_ref,
                w_mp_ref, b_mp_ref, o_ref, h_scr, acc_scr, *, gelu_bf16):
    hk = pl.program_id(2)

    @pl.when(hk == 0)
    def _init():
        x1 = x_ref[0] + y_ref[0].astype(jnp.float32)      # attention residual (f32)
        acc_scr[...] = x1 + b_mp_ref[0]                   # residual + mlp c_proj bias
        h_scr[...] = _layer_norm(x1, ln2w_ref[0], ln2b_ref[0]).astype(jnp.bfloat16)

    f = jnp.dot(h_scr[...], w_fc_ref[...],
                preferred_element_type=jnp.float32) + b_fc_ref[0]
    if gelu_bf16:                                         # bf16 VALU/EUP (v6e/v7x)
        f = f.astype(jnp.bfloat16)
    f = _gelu_tanh(f)
    acc_scr[...] += jnp.dot(f.astype(jnp.bfloat16), w_mp_ref[...],
                            preferred_element_type=jnp.float32)

    @pl.when(hk == pl.num_programs(2) - 1)
    def _finalize():
        o_ref[0] = acc_scr[...].astype(o_ref.dtype)


# ------------------------------- block wrapper -------------------------------

def gpt2_block(x, params, n_head, *, config=None):
    """One GPT-2 Block: x + attn(ln_1(x)), then + mlp(ln_2(.)).  x: (B, T, C) f32."""
    (ln1_w, ln1_b, w_attn, b_attn, w_cproj, b_cproj,
     ln2_w, ln2_b, w_fc, b_fc, w_mproj, b_mproj) = params
    B, T, C = x.shape
    assert C % n_head == 0
    hd = C // n_head
    cfg = _device_config() if config is None else config
    bf16 = jnp.bfloat16

    row_tile = _choose_tile(T, 256, 8)                    # kernels 1 & 3 seq tile
    tq = _choose_tile(T, cfg["tq"], 128)                  # attention q tile
    tkv = _choose_tile(T, cfg["tkv"], 128)                # attention kv tile
    nt = T // row_tile
    hidden_tile = _choose_tile(4 * C, 2048, 128)          # bounds kernel-3 weight residency
    nh = (4 * C) // hidden_tile

    # Fold the 1/sqrt(hd) softmax scale into the Q projection (host-side, one-time).
    scale = 1.0 / math.sqrt(hd)
    w_attn_s = jnp.concatenate([w_attn[:, :C] * scale, w_attn[:, C:]], axis=1)
    b_attn_s = jnp.concatenate([b_attn[:, :C] * scale, b_attn[:, C:]], axis=1)

    # bf16 weights: MXU-native and half the resident VMEM footprint.
    # TODO(synk): at GPT-2 medium/XL sizes also set pipeline_mode=pl.Buffered(1)
    # on the grid-invariant weight specs and carry a bf16 residual stream.
    w_attn_b = w_attn_s.astype(bf16)
    w_cproj_b = w_cproj.astype(bf16)
    w_fc_b = w_fc.astype(bf16)
    w_mproj_b = w_mproj.astype(bf16)

    def full_spec(shape):
        nd = len(shape)
        return pl.BlockSpec(shape, lambda *_: (0,) * nd)

    # ---- kernel 1: ln_1 + fused QKV projection (lane-dense (B, T, C) outputs) ----
    row_spec_2 = pl.BlockSpec((1, row_tile, C), lambda b, t: (b, t, 0))
    q, k, v = pl.pallas_call(
        _ln_qkv_kernel,
        out_shape=tuple(jax.ShapeDtypeStruct((B, T, C), bf16) for _ in range(3)),
        grid_spec=pltpu.PrefetchScalarGridSpec(
            num_scalar_prefetch=0,
            grid=(B, nt),
            in_specs=[row_spec_2,
                      full_spec((1, C)), full_spec((1, C)),
                      full_spec((C, 3 * C)), full_spec((1, 3 * C))],
            out_specs=(row_spec_2, row_spec_2, row_spec_2)),
        compiler_params=pltpu.CompilerParams(
            dimension_semantics=("parallel", "parallel"),
            vmem_limit_bytes=cfg["vmem_limit"]),
        cost_estimate=pl.CostEstimate(
            flops=2 * B * T * C * 3 * C,
            transcendentals=0,
            bytes_accessed=4 * B * T * C + 2 * C * 3 * C + 3 * 2 * B * T * C),
    )(x, ln1_w, ln1_b, w_attn_b, b_attn_s)

    # ---- kernel 2: flash attention on the lower-triangular (qi, ki) pair grid ----
    pairs = [(qi, ki)
             for qi in range(T // tq)
             for ki in range((qi * tq + tq - 1) // tkv + 1)]
    n_pairs = len(pairs)
    qi_tab = jnp.array([p[0] for p in pairs], jnp.int32)
    ki_tab = jnp.array([p[1] for p in pairs], jnp.int32)

    attn_flops = B * (n_pairs * n_head * 4 * tq * tkv * hd + 2 * T * C * C)
    attn_bytes = B * (n_pairs * (tq + 2 * tkv) * C * 2 + 2 * T * C) + 2 * C * C

    y = pl.pallas_call(
        functools.partial(_flash_attn_kernel, n_head=n_head),
        out_shape=jax.ShapeDtypeStruct((B, T, C), bf16),
        grid_spec=pltpu.PrefetchScalarGridSpec(
            num_scalar_prefetch=2,
            grid=(B, n_pairs),
            in_specs=[
                pl.BlockSpec((1, tq, C), lambda b, pr, qt, kt: (b, qt[pr], 0)),
                pl.BlockSpec((1, tkv, C), lambda b, pr, qt, kt: (b, kt[pr], 0)),
                pl.BlockSpec((1, tkv, C), lambda b, pr, qt, kt: (b, kt[pr], 0)),
                full_spec((C, C)), full_spec((1, C)),
            ],
            out_specs=pl.BlockSpec((1, tq, C), lambda b, pr, qt, kt: (b, qt[pr], 0)),
            scratch_shapes=[
                pltpu.VMEM((n_head, tq, 1), jnp.float32),    # running max
                pltpu.VMEM((n_head, tq, 1), jnp.float32),    # running denominator
                pltpu.VMEM((n_head, tq, hd), jnp.float32),   # output accumulator
            ]),
        compiler_params=pltpu.CompilerParams(
            dimension_semantics=("parallel", "arbitrary"),
            vmem_limit_bytes=cfg["vmem_limit"]),
        cost_estimate=pl.CostEstimate(
            flops=attn_flops,
            transcendentals=B * n_pairs * n_head * tq * tkv,
            bytes_accessed=attn_bytes),
    )(qi_tab, ki_tab, q, k, v, w_cproj_b, b_cproj)

    # ---- kernel 3: attn residual + ln_2 + MLP(GELU tanh) + residual, hidden-tiled ----
    row_spec_3 = pl.BlockSpec((1, row_tile, C), lambda b, t, hk: (b, t, 0))
    return pl.pallas_call(
        functools.partial(_mlp_kernel, gelu_bf16=cfg["gelu_bf16"]),
        out_shape=jax.ShapeDtypeStruct((B, T, C), x.dtype),
        grid_spec=pltpu.PrefetchScalarGridSpec(
            num_scalar_prefetch=0,
            grid=(B, nt, nh),
            in_specs=[
                row_spec_3,                                            # x (f32 residual)
                row_spec_3,                                            # attn out (bf16)
                full_spec((1, C)), full_spec((1, C)),                  # ln_2
                pl.BlockSpec((C, hidden_tile), lambda b, t, hk: (0, hk)),
                pl.BlockSpec((1, hidden_tile), lambda b, t, hk: (0, hk)),
                pl.BlockSpec((hidden_tile, C), lambda b, t, hk: (hk, 0)),
                full_spec((1, C)),
            ],
            out_specs=row_spec_3,
            scratch_shapes=[
                pltpu.VMEM((row_tile, C), jnp.bfloat16),   # ln_2(x1) (reused per h-tile)
                pltpu.VMEM((row_tile, C), jnp.float32),    # residual + MLP accumulator
            ]),
        compiler_params=pltpu.CompilerParams(
            dimension_semantics=("parallel", "parallel", "arbitrary"),
            vmem_limit_bytes=cfg["vmem_limit"]),
        cost_estimate=pl.CostEstimate(
            flops=16 * B * T * C * C,
            transcendentals=B * T * 4 * C,
            bytes_accessed=((B * nt if nh > 1 else 1) * 2 * 8 * C * C
                            + 3 * 4 * B * T * C)),
    )(x, y, ln2_w, ln2_b, w_fc_b, b_fc, w_mproj_b, b_mproj)


# --------------------------- pure-JAX block reference ---------------------------

def gpt2_block_ref(x, params, n_head):
    (ln1_w, ln1_b, w_attn, b_attn, w_cproj, b_cproj,
     ln2_w, ln2_b, w_fc, b_fc, w_mproj, b_mproj) = params
    B, T, C = x.shape
    hd = C // n_head

    def ln(z, w, b):
        mu = jnp.mean(z, axis=-1, keepdims=True)
        var = jnp.mean((z - mu) ** 2, axis=-1, keepdims=True)
        return (z - mu) / jnp.sqrt(var + 1e-5) * w[0] + b[0]

    h = ln(x, ln1_w, ln1_b)
    qkv = h @ w_attn + b_attn[0]
    q, k, v = jnp.split(qkv, 3, axis=-1)
    q = q.reshape(B, T, n_head, hd).transpose(0, 2, 1, 3)
    k = k.reshape(B, T, n_head, hd).transpose(0, 2, 1, 3)
    v = v.reshape(B, T, n_head, hd).transpose(0, 2, 1, 3)
    s = jnp.einsum('bhqd,bhkd->bhqk', q, k) / math.sqrt(hd)
    mask = jnp.tril(jnp.ones((T, T), bool))
    s = jnp.where(mask, s, -jnp.inf)
    p = jax.nn.softmax(s, axis=-1)
    y = jnp.einsum('bhqk,bhkd->bhqd', p, v)
    y = y.transpose(0, 2, 1, 3).reshape(B, T, C)
    x = x + (y @ w_cproj + b_cproj[0])

    h2 = ln(x, ln2_w, ln2_b)
    f = h2 @ w_fc + b_fc[0]
    c = math.sqrt(2.0 / math.pi)
    f = 0.5 * f * (1.0 + jnp.tanh(c * (f + 0.044715 * f ** 3)))
    return x + (f @ w_mproj + b_mproj[0])


# ----------------------- full GPT forward (targets=None) -----------------------

def gpt2_forward(idx, gpt_params, n_head, block_fn):
    """GPT.forward with targets=None: returns logits (B, T, vocab)."""
    wte, wpe, block_params, lnf_w, lnf_b = gpt_params
    B, T = idx.shape
    # TODO(synk): token/position embedding gather, final LayerNorm, the weight-tied
    # lm_head matmul and the optional cross-entropy loss stay in plain JAX/XLA;
    # only the transformer blocks run as Pallas kernels.
    x = wte[idx] + wpe[:T][None, :, :]
    for bp in block_params:
        x = block_fn(x, bp, n_head)
    mu = jnp.mean(x, axis=-1, keepdims=True)
    var = jnp.mean((x - mu) ** 2, axis=-1, keepdims=True)
    x = (x - mu) * lax.rsqrt(var + 1e-5) * lnf_w + lnf_b
    return x @ wte.T


# ------------------------------- param builders -------------------------------

def make_block_params(key, C):
    ks = jax.random.split(key, 8)

    def w(k, fi, fo):
        return jax.random.normal(k, (fi, fo), jnp.float32) / math.sqrt(fi)

    def b(k, n):
        return 0.1 * jax.random.normal(k, (1, n), jnp.float32)

    return (
        jnp.ones((1, C), jnp.float32), jnp.zeros((1, C), jnp.float32),   # ln_1
        w(ks[0], C, 3 * C), b(ks[1], 3 * C),                             # c_attn
        w(ks[2], C, C), b(ks[3], C),                                     # attn c_proj
        jnp.ones((1, C), jnp.float32), jnp.zeros((1, C), jnp.float32),   # ln_2
        w(ks[4], C, 4 * C), b(ks[5], 4 * C),                             # mlp c_fc
        w(ks[6], 4 * C, C), b(ks[7], C),                                 # mlp c_proj
    )


def make_gpt_params(key, vocab, block_size, C, n_layer):
    ks = jax.random.split(key, n_layer + 2)
    wte = 0.02 * jax.random.normal(ks[0], (vocab, C), jnp.float32)
    wpe = 0.02 * jax.random.normal(ks[1], (block_size, C), jnp.float32)
    blocks = [make_block_params(ks[2 + i], C) for i in range(n_layer)]
    return wte, wpe, blocks, jnp.ones((C,), jnp.float32), jnp.zeros((C,), jnp.float32)


# ------------------------------------ main ------------------------------------

if __name__ == "__main__":
    B, T, C, n_head = 2, 8, 32, 4
    n_layer, vocab, block_size = 2, 64, 16

    key = jax.random.PRNGKey(0)
    k_x, k_idx, k_blk, k_gpt = jax.random.split(key, 4)

    # --- single transformer Block: Pallas kernels vs pure-JAX reference ---
    x = jax.random.normal(k_x, (B, T, C), jnp.float32)
    blk_params = make_block_params(k_blk, C)
    out = jax.block_until_ready(gpt2_block(x, blk_params, n_head))
    ref = gpt2_block_ref(x, blk_params, n_head)
    assert out.shape == (B, T, C)
    # bf16 matmuls with f32 accumulation -> loosened tolerance vs f32 reference
    assert bool(jnp.allclose(out, ref, atol=5e-2, rtol=5e-2)), "block mismatch"

    # --- full GPT forward (embeddings + blocks + ln_f + lm_head, targets=None) ---
    idx = jax.random.randint(k_idx, (B, T), 0, vocab)
    gpt_params = make_gpt_params(k_gpt, vocab, block_size, C, n_layer)
    logits = jax.block_until_ready(gpt2_forward(idx, gpt_params, n_head, gpt2_block))
    logits_ref = gpt2_forward(idx, gpt_params, n_head, gpt2_block_ref)
    assert logits.shape == (B, T, vocab)
    assert bool(jnp.allclose(logits, logits_ref, atol=5e-2, rtol=5e-2)), "GPT mismatch"

    print("KERNEL_OK")
</pallas_src>

<mosaic_0001>
module attributes {stable_mosaic.version = 11 : i64} {
  func.func @_ln_qkv_kernel(%arg0: i32, %arg1: i32, %arg2: memref<1x8x32xf32, #tpu.memory_space<vmem>>, %arg3: memref<1x32xf32, #tpu.memory_space<vmem>>, %arg4: memref<1x32xf32, #tpu.memory_space<vmem>>, %arg5: memref<32x96xbf16, #tpu.memory_space<vmem>>, %arg6: memref<1x96xf32, #tpu.memory_space<vmem>>, %arg7: memref<1x8x32xbf16, #tpu.memory_space<vmem>>, %arg8: memref<1x8x32xbf16, #tpu.memory_space<vmem>>, %arg9: memref<1x8x32xbf16, #tpu.memory_space<vmem>>) attributes {dimension_semantics = [#tpu.dimension_semantics<parallel>, #tpu.dimension_semantics<parallel>], iteration_bounds = array<i64: 2, 1>, scalar_prefetch = 0 : i64, scratch_operands = 0 : i64, tpu.core_type = #tpu.core_type<tc>, window_params = [{transform_indices = @transform_0, window_bounds = array<i64: 1, 8, 32>}, {pipeline_mode = #tpu.pipeline_mode<synchronous>, transform_indices = @transform_1, window_bounds = array<i64: 1, 32>}, {pipeline_mode = #tpu.pipeline_mode<synchronous>, transform_indices = @transform_2, window_bounds = array<i64: 1, 32>}, {pipeline_mode = #tpu.pipeline_mode<synchronous>, transform_indices = @transform_3, window_bounds = array<i64: 32, 96>}, {pipeline_mode = #tpu.pipeline_mode<synchronous>, transform_indices = @transform_4, window_bounds = array<i64: 1, 96>}, {transform_indices = @transform_5, window_bounds = array<i64: 1, 8, 32>}, {transform_indices = @transform_6, window_bounds = array<i64: 1, 8, 32>}, {transform_indices = @transform_7, window_bounds = array<i64: 1, 8, 32>}]} {
    %c0 = arith.constant 0 : index
    %c0_0 = arith.constant 0 : index
    %c0_1 = arith.constant 0 : index
    %0 = vector.load %arg2[%c0, %c0_0, %c0_1] : memref<1x8x32xf32, #tpu.memory_space<vmem>>, vector<1x8x32xf32>
    %1 = vector.shape_cast %0 : vector<1x8x32xf32> to vector<8x32xf32>
    %c0_2 = arith.constant 0 : index
    %c0_3 = arith.constant 0 : index
    %2 = vector.load %arg3[%c0_2, %c0_3] : memref<1x32xf32, #tpu.memory_space<vmem>>, vector<1x32xf32>
    %3 = vector.shape_cast %2 : vector<1x32xf32> to vector<32xf32>
    %c0_4 = arith.constant 0 : index
    %c0_5 = arith.constant 0 : index
    %4 = vector.load %arg4[%c0_4, %c0_5] : memref<1x32xf32, #tpu.memory_space<vmem>>, vector<1x32xf32>
    %5 = vector.shape_cast %4 : vector<1x32xf32> to vector<32xf32>
    %cst = arith.constant dense<0.000000e+00> : vector<8xf32>
    %6 = vector.multi_reduction <add>, %1, %cst [1] : vector<8x32xf32> to vector<8xf32>
    %7 = vector.shape_cast %6 : vector<8xf32> to vector<8x1xf32>
    %cst_6 = arith.constant 3.200000e+01 : f32
    %8 = vector.broadcast %cst_6 : f32 to vector<8x1xf32>
    %9 = arith.divf %7, %8 : vector<8x1xf32>
    %10 = vector.broadcast %9 : vector<8x1xf32> to vector<8x32xf32>
    %11 = arith.subf %1, %10 : vector<8x32xf32>
    %12 = arith.mulf %11, %11 : vector<8x32xf32>
    %cst_7 = arith.constant dense<0.000000e+00> : vector<8xf32>
    %13 = vector.multi_reduction <add>, %12, %cst_7 [1] : vector<8x32xf32> to vector<8xf32>
    %14 = vector.shape_cast %13 : vector<8xf32> to vector<8x1xf32>
    %cst_8 = arith.constant 3.200000e+01 : f32
    %15 = vector.broadcast %cst_8 : f32 to vector<8x1xf32>
    %16 = arith.divf %14, %15 : vector<8x1xf32>
    %17 = vector.broadcast %9 : vector<8x1xf32> to vector<8x32xf32>
    %18 = arith.subf %1, %17 : vector<8x32xf32>
    %cst_9 = arith.constant 9.99999974E-6 : f32
    %19 = vector.broadcast %cst_9 : f32 to vector<8x1xf32>
    %20 = arith.addf %16, %19 : vector<8x1xf32>
    %21 = math.rsqrt %20 : vector<8x1xf32>
    %22 = vector.broadcast %21 : vector<8x1xf32> to vector<8x32xf32>
    %23 = arith.mulf %18, %22 : vector<8x32xf32>
    %24 = vector.shape_cast %3 : vector<32xf32> to vector<1x32xf32>
    %25 = vector.broadcast %24 : vector<1x32xf32> to vector<8x32xf32>
    %26 = arith.mulf %23, %25 : vector<8x32xf32>
    %27 = vector.shape_cast %5 : vector<32xf32> to vector<1x32xf32>
    %28 = vector.broadcast %27 : vector<1x32xf32> to vector<8x32xf32>
    %29 = arith.addf %26, %28 : vector<8x32xf32>
    %30 = arith.truncf %29 : vector<8x32xf32> to vector<8x32xbf16>
    %c0_10 = arith.constant 0 : index
    %c0_11 = arith.constant 0 : index
    %31 = vector.load %arg5[%c0_10, %c0_11] : memref<32x96xbf16, #tpu.memory_space<vmem>>, vector<32x96xbf16>
    %cst_12 = arith.constant dense<0.000000e+00> : vector<8x96xf32>
    %32 = tpu.matmul %30, %31, %cst_12 {dimension_numbers = #tpu.dot_dimension_numbers<[1], [0], [0], [1], [0, 0, 1, 1], [], []>} : vector<8x32xbf16>, vector<32x96xbf16>, vector<8x96xf32> -> vector<8x96xf32>
    %c0_13 = arith.constant 0 : index
    %c0_14 = arith.constant 0 : index
    %33 = vector.load %arg6[%c0_13, %c0_14] : memref<1x96xf32, #tpu.memory_space<vmem>>, vector<1x96xf32>
    %34 = vector.shape_cast %33 : vector<1x96xf32> to vector<96xf32>
    %35 = vector.shape_cast %34 : vector<96xf32> to vector<1x96xf32>
    %36 = vector.broadcast %35 : vector<1x96xf32> to vector<8x96xf32>
    %37 = arith.addf %32, %36 : vector<8x96xf32>
    %38 = vector.extract_strided_slice %37 {offsets = [0, 0], sizes = [8, 32], strides = [1, 1]} : vector<8x96xf32> to vector<8x32xf32>
    %39 = arith.truncf %38 : vector<8x32xf32> to vector<8x32xbf16>
    %c0_15 = arith.constant 0 : index
    %c0_16 = arith.constant 0 : index
    %c0_17 = arith.constant 0 : index
    %40 = vector.load %arg7[%c0_15, %c0_16, %c0_17] : memref<1x8x32xbf16, #tpu.memory_space<vmem>>, vector<1x8x32xbf16>
    %41 = vector.shape_cast %40 : vector<1x8x32xbf16> to vector<8x32xbf16>
    %42 = vector.shape_cast %39 : vector<8x32xbf16> to vector<1x8x32xbf16>
    tpu.vector_store %arg7[%c0_15, %c0_16, %c0_17], %42 {strides = array<i32>} : memref<1x8x32xbf16, #tpu.memory_space<vmem>>, vector<1x8x32xbf16>,
    %43 = vector.extract_strided_slice %37 {offsets = [0, 32], sizes = [8, 32], strides = [1, 1]} : vector<8x96xf32> to vector<8x32xf32>
    %44 = arith.truncf %43 : vector<8x32xf32> to vector<8x32xbf16>
    %c0_18 = arith.constant 0 : index
    %c0_19 = arith.constant 0 : index
    %c0_20 = arith.constant 0 : index
    %45 = vector.load %arg8[%c0_18, %c0_19, %c0_20] : memref<1x8x32xbf16, #tpu.memory_space<vmem>>, vector<1x8x32xbf16>
    %46 = vector.shape_cast %45 : vector<1x8x32xbf16> to vector<8x32xbf16>
    %47 = vector.shape_cast %44 : vector<8x32xbf16> to vector<1x8x32xbf16>
    tpu.vector_store %arg8[%c0_18, %c0_19, %c0_20], %47 {strides = array<i32>} : memref<1x8x32xbf16, #tpu.memory_space<vmem>>, vector<1x8x32xbf16>,
    %48 = vector.extract_strided_slice %37 {offsets = [0, 64], sizes = [8, 32], strides = [1, 1]} : vector<8x96xf32> to vector<8x32xf32>
    %49 = arith.truncf %48 : vector<8x32xf32> to vector<8x32xbf16>
    %c0_21 = arith.constant 0 : index
    %c0_22 = arith.constant 0 : index
    %c0_23 = arith.constant 0 : index
    %50 = vector.load %arg9[%c0_21, %c0_22, %c0_23] : memref<1x8x32xbf16, #tpu.memory_space<vmem>>, vector<1x8x32xbf16>
    %51 = vector.shape_cast %50 : vector<1x8x32xbf16> to vector<8x32xbf16>
    %52 = vector.shape_cast %49 : vector<8x32xbf16> to vector<1x8x32xbf16>
    tpu.vector_store %arg9[%c0_21, %c0_22, %c0_23], %52 {strides = array<i32>} : memref<1x8x32xbf16, #tpu.memory_space<vmem>>, vector<1x8x32xbf16>,
    return
  }
  func.func @transform_0(%arg0: i32, %arg1: i32) -> (i32, i32, i32) {
    %c0_i32 = arith.constant 0 : i32
    %c0_i32_0 = arith.constant 0 : i32
    return %arg0, %arg1, %c0_i32 : i32, i32, i32
  }
  func.func @transform_1(%arg0: i32, %arg1: i32) -> (i32, i32) {
    %c0_i32 = arith.constant 0 : i32
    %c0_i32_0 = arith.constant 0 : i32
    %c0_i32_1 = arith.constant 0 : i32
    return %c0_i32, %c0_i32_0 : i32, i32
  }
  func.func @transform_2(%arg0: i32, %arg1: i32) -> (i32, i32) {
    %c0_i32 = arith.constant 0 : i32
    %c0_i32_0 = arith.constant 0 : i32
    %c0_i32_1 = arith.constant 0 : i32
    return %c0_i32, %c0_i32_0 : i32, i32
  }
  func.func @transform_3(%arg0: i32, %arg1: i32) -> (i32, i32) {
    %c0_i32 = arith.constant 0 : i32
    %c0_i32_0 = arith.constant 0 : i32
    %c0_i32_1 = arith.constant 0 : i32
    return %c0_i32, %c0_i32_0 : i32, i32
  }
  func.func @transform_4(%arg0: i32, %arg1: i32) -> (i32, i32) {
    %c0_i32 = arith.constant 0 : i32
    %c0_i32_0 = arith.constant 0 : i32
    %c0_i32_1 = arith.constant 0 : i32
    return %c0_i32, %c0_i32_0 : i32, i32
  }
  func.func @transform_5(%arg0: i32, %arg1: i32) -> (i32, i32, i32) {
    %c0_i32 = arith.constant 0 : i32
    %c0_i32_0 = arith.constant 0 : i32
    return %arg0, %arg1, %c0_i32 : i32, i32, i32
  }
  func.func @transform_6(%arg0: i32, %arg1: i32) -> (i32, i32, i32) {
    %c0_i32 = arith.constant 0 : i32
    %c0_i32_0 = arith.constant 0 : i32
    return %arg0, %arg1, %c0_i32 : i32, i32, i32
  }
  func.func @transform_7(%arg0: i32, %arg1: i32) -> (i32, i32, i32) {
    %c0_i32 = arith.constant 0 : i32
    %c0_i32_0 = arith.constant 0 : i32
    return %arg0, %arg1, %c0_i32 : i32, i32, i32
  }
}

</mosaic_0001>

<bundles_post_ra>
// kernel: tpu_custom_call.1
= control target key start
LH: loop header
LB: loop body
LE: loop exit
PB: predicated region body
PF: predicated region fallthrough
CT: control target
= control target key end

     0   :  { %s1302_s0 = inlined_call_operand.hbm [shape: f32[2,8,32], index: 0, kind: input, shape index: {}]   ;;  %s1303_s1 = inlined_call_operand.hbm [shape: f32[1,32], index: 1, kind: input, shape index: {}]   ;;  %s1304_s2 = inlined_call_operand.vmem [shape: f32[1,32], index: 2, kind: input, shape index: {}]   ;;  %s1305_s3 = inlined_call_operand.hbm [shape: bf16[32,96], index: 3, kind: input, shape index: {}]   ;;  %s1306_s4 = inlined_call_operand.vmem [shape: f32[1,96], index: 4, kind: input, shape index: {}]   ;;  %s1307_s5 = inlined_call_operand.hbm [shape: bf16[2,8,32], index: 5, kind: output, shape index: {0}]   ;;  %s1308_s6 = inlined_call_operand.hbm [shape: bf16[2,8,32], index: 6, kind: output, shape index: {1}]   ;;  %s1309_s7 = inlined_call_operand.hbm [shape: bf16[2,8,32], index: 7, kind: output, shape index: {2}]  }
   0x1   :  { %1311 = sst [smem:[#allocation16_spill]] %s1302_s0 }
   0x2   :  { %1312 = sst [smem:[#allocation17_spill]] %s1303_s1 }
   0x3   :  { %1313 = sst [smem:[#allocation18_spill]] %s1305_s3 }
   0x4   :  { %13 = vsyncpa [#allocation3], 0 }
   0x5   :  { %15 = vsyncpa [#allocation3 + $0x1], 0 }
   0x6   :  { %16 = vsyncpa [#allocation6], 0 }
   0x7   :  { %17 = vsyncpa [#allocation4], 0 }
   0x8   :  { %19 = vsyncpa [#allocation4 + $0x1], 0 }
   0x9   :  { %20 = vsyncpa [#allocation10], 0 }
   0xa   :  { %22 = vsyncpa [#allocation10 + $0x1], 0  ;;  %s1102_s24 = smov 0   ;;  %s1104_s25 = smov 0  }
   0xb   :  { %s1106_s26 = smov 0   ;;  %s1108_s27 = smov 0  }
   0xc   :  { %s1110_s28 = smov 0   ;;  %s1112_s29 = smov 0  }
   0xd LB: > { %s1133_s30 = sadd.s32 4294967295, %s1053_s29   ;;  %s1310_s8 = sadd.s32 4294967294, %s1053_s29   ;;  %s1053_s29 = sphi %s1112_s29, %s28_s29   ;;  %s1049_s28 = sphi %s1110_s28, %s1326_s28   ;;  %s1045_s27 = sphi %s1108_s27, %s1325_s27   ;;  %s1041_s26 = sphi %s1106_s26, %s1324_s26   ;;  %s1037_s25 = sphi %s1104_s25, %s1323_s25   ;;  %s1033_s24 = sphi %s1102_s24, %s1322_s24  }
   0xe   : > { %p62_p0 = scmp.ne.s32.totalorder %s1037_s25, %s1033_s24  ;;  %p63_p1 = scmp.eq.s32.totalorder %s1133_s30, 0 }
   0xf   : > { %p178_p2 = scmp.eq.s32.totalorder %s1310_s8, 1  ;;  %p680_p4 = scmp.ge.s32.totalorder %s1053_s29, 1 }
  0x10   : > { %p1143_p3 = por %p63_p1, %p62_p0  ;;  %p241_p6 = scmp.lt.s32.totalorder %s1053_s29, 3 }
  0x11   : > { %p1148_p5 = por %p178_p2, %p62_p0  ;;  %s1316_s1 = sld [smem:[#allocation17_spill]] }
  0x12   : > { %p1156_p7 = pnand %p680_p4, %p241_p6  ;;  %p683_p8 = scmp.ge.s32.totalorder %s1053_s29, 2 }
  0x13   : > { %s1055_s15 = smov [#allocation5]   ;;  %s1318_s3 = sld [smem:[#allocation18_spill]] }
  0x14   : > { %p728_p9 = pneg %p1156_p7  ;;  %s255_s16 = sshll.u32 %s1055_s15, 4  ;;  %s256_s16 = int_to_ptr.vmem [resolvable:$true] %s255_s16 }
  0x15   : > { %s1056_s20 = smov [#allocation7]   ;;  %s1057_s22 = smov 64  }
  0x16   : > { %p729_p10 = pnand %p728_p9, %p63_p1  ;;  %s269_s21 = sshll.u32 %s1056_s20, 4  ;;  %s270_s21 = int_to_ptr.vmem [resolvable:$true] %s269_s21 }
  0x17   : > { %s253_s13 = sshll.u32 %s1316_s1, 4  ;;  %s1058_s23 = smov 4   ;;  %s254_s13 = int_to_ptr.hbm [resolvable:$true] %s253_s13 }
  0x18   : > { %731 = dma.hbm_to_vmem [thread:$0]  (!%p729_p10), %s254_s13, 16, %s256_s16, [#allocation6]  }
  0x19   : > { %s267_s19 = sshll.u32 %s1318_s3, 4  ;;  %p172_p11 = scmp.eq.s32.totalorder %s1133_s30, 1  ;;  %s268_s19 = int_to_ptr.hbm [resolvable:$true] %s267_s19 }
  0x1a   : > { %734 = dma.hbm_to_vmem [thread:$0]  (!%p729_p10), %s268_s19, 256, %s270_s21, [#allocation6], %s1057_s22, %s1057_s22, %s1058_s23  }
  0x1b   : > { %s40_s11 = sadd.s32 1, %s1049_s28  ;;  %s49_s12 = sadd.s32 1, %s1041_s26 }
  0x1c   : > { %p42_p12 = scmp.ge.s32.totalorder %s40_s11, 2  ;;  %p56_p13 = scmp.ne.s32.totalorder %s1041_s26, %s1037_s25 }
  0x1d   : > { %p57_p0 = scmp.eq.s32.totalorder %s1053_s29, 0  ;;  %p751_p4 = scmp.lt.s32.totalorder %s1053_s29, 2 }
  0x1e   : > { %s1328_s11 = smov (%p42_p12, %s40_s11), 0  ;;  %p1176_p2 = por %p172_p11, %p56_p13 }
  0x1f   : > { %s44_s13 = ssub.s32 %s1049_s28, %s1328_s11  ;;  %s286_s16 = sand.u32 1, %s1041_s26  }
  0x20   : > { %p47_p6 = scmp.eq.s32.totalorder %s44_s13, 0  ;;  %p58_p9 = por %p57_p0, %p56_p13 }
  0x21   : > { %s684_s17 = sshll.u32 %s286_s16, 3  ;;  %s685_s18 = sshll.u32 %s1049_s28, 3 }
  0x22   : > { %s1186_s19 = scalar_select %p47_p6, %s1041_s26, %s49_s12  }
  0x23   : > { %s1320_s0 = sld [smem:[#allocation16_spill]]  ;;  %s290_s8 = scalar_lea.vmem [#allocation2], %s684_s17 }
  0x24   : > { %s299_s1 = sshll.u32 %s290_s8, 4  ;;  %p736_p10 = pnand %p751_p4, %p58_p9  ;;  %s300_s1 = int_to_ptr.vmem [resolvable:$true] %s299_s1 }
  0x25   : > { %s287_s3 = scalar_lea.sflag [#allocation3], %s286_s16  ;;  %s1196_s12 = sand.u32 (!%p1156_p7), 1, %s1037_s25  }
  0x26   : > { %s687_s13 = sshll.u32 (!%p1156_p7), %s1196_s12, 3 }
  0x27   : > { %308 = sbr.rel (%p1156_p7) target bundleno = 579 (0x243), region = 40  ;;  %s314_s20 = scalar_lea.vmem (!%p1156_p7), [#allocation2], %s687_s13 }
  0x29   : > { %s295_s22 = scalar_lea.hbm %s1320_s0, %s685_s18  ;;  %s311_s18 = scalar_lea.sflag (!%p1156_p7), [#allocation3], %s1196_s12 }
  0x2a   : > { %s297_s23 = sshll.u32 %s295_s22, 4  ;;  %s298_s23 = int_to_ptr.hbm [resolvable:$true] %s297_s23 }
  0x2b   : > { %738 = dma.hbm_to_vmem [thread:$0]  (!%p736_p10), %s298_s23, 128, %s300_s1, %s287_s3  }
  0x2c   : > { %1016 = dma.done.wait (%p1143_p3), %s311_s18, 128  }
  0x2d   : > { %1018 = vsyncadd (%p1143_p3), %s311_s18, 4294967168 }
  0x2e   : > { %1020 = dma.done.wait (%p63_p1), [#allocation6], 272  }
  0x2f   : > { %1022 = vsyncadd (%p63_p1), [#allocation6], 4294967024  ;;  %vm370_vm0 = vcmask 261120   ;;  %v367_v0 = vld [vmem:[%s314_s20] sm:$0xff]  ;;  %v1059_v2 = vmov 32.0   ;;  %v710_v15 = vld [vmem:[#allocation7] sm:$0xff] }
  0x30   : > { %v371_v1 = vsel %vm370_vm0, %v367_v0, 0.0  ;;  %813 = vrcp.f32 %v1059_v2  ;;  %v711_v14 = vld [vmem:[#allocation7 + $0x8] sm:$0xff]  ;;  %v810_v25 = vld [vmem:[#allocation5] ss:$0 sm:$0xff]  ;;  %s1218_s14 = sshll.u32 %s1196_s12, 2  ;;  %s1221_s16 = sshll.u32 %s1045_s27, 2 }
  0x31   : > { %372 = vadd.xlane.f32.xlu0 %v371_v1  ;;  %438 = vmatpush.bf16.msra.mxu0 %v711_v14  ;;  %v811_v28 = vld [vmem:[%s1304_s2] ss:$0 sm:$0xff]  ;;  %s479_s22 = scalar_lea.hbm %s1307_s5, %s1221_s16  ;;  %vm446_vm5 = vcmask 257024   ;;  %s351_s23 = scalar_lea.vmem [#allocation8], %s1218_s14 }
  0x32   : > { %v812_v32 = vld [vmem:[%s1306_s4] ss:$0 sm:$0xff]  ;;  %s481_s13 = sshll.u32 %s351_s23, 4  ;;  %s483_s18 = sshll.u32 %s479_s22, 4  ;;  %s482_s13 = int_to_ptr.vmem [resolvable:$true] %s481_s13  ;;  %s484_s18 = int_to_ptr.hbm [resolvable:$true] %s483_s18 }
  0x33   : > { %s1060_s20 = smov 96   ;;  %s458_s27 = scalar_lea.sflag [#allocation4], %s1196_s12 }
  0x34   : > { %s921_s1 = sshra.s32 %s484_s18, 4  ;;  %s927_s17 = scalar_lea.hbm %s1307_s5, 8  ;;  %s922_s1 = int_to_ptr.hbm [resolvable:$true] %s921_s1 }
  0x35   : > { %439 = vmatpush.bf16.msra.mxu0 %v710_v15  ;;  %s923_s3 = scalar_lea.hbm %s922_s1, 4  ;;  %p928_p11 = scmp.lt.s32.totalorder %s922_s1, %s1307_s5 }
  0x36   : > { %v814_v3 = vpop.eup %813  ;;  %p924_p1 = scmp.ne.s32.totalorder %s922_s1, %s923_s3  ;;  %p929_p12 = scmp.lt.s32.totalorder %s927_s17, %s923_s3 }
  0x37   : > { %v375_v4 = vmul.f32 32.0, %v814_v3  ;;  %vm379_vm1 = vweird.f32 %v814_v3 }
  0x38   : > { %p925_p3 = pnand %p924_p1, %p1176_p2  ;;  %p930_p13 = por %p929_p12, %p928_p11 }
  0x39   : > { %v376_v5 = vsub.f32 1.0, %v375_v4 }
  0x3a   : > { %p926_p7 = pneg %p925_p3 }
  0x3b   : > { %v377_v6 = vmul.f32 %v814_v3, %v376_v5 }
  0x3c   : > { %p931_p0 = pnand %p930_p13, %p926_p7 }
  0x3d   : > { %v378_v7 = vadd.f32 %v814_v3, %v377_v6 }
  0x3f   : > { %v380_v8 = vsel %vm379_vm1, %v814_v3, %v378_v7 }
  0xa4   : > { %v373_v9 = vpop.xlane.xlu0 %372 }
  0xa5   : > { %v381_v10 = vmul.f32 %v380_v8, %v373_v9 }
  0xa7   : > { %v382_v11 = vsub.f32 %v367_v0, %v381_v10 }
  0xa9   : > { %v383_v12 = vmul.f32 %v382_v11, %v382_v11 }
  0xab   : > { %v384_v13 = vsel %vm370_vm0, %v383_v12, 0.0 }
  0xac   : > { %385 = vadd.xlane.f32.xlu0 %v384_v13 }
 0x11f   : > { %v386_v16 = vpop.xlane.xlu0 %385 }
 0x120   : > { %v387_v17 = vmul.f32 %v386_v16, %v380_v8 }
 0x122   : > { %v388_v18 = vadd.f32 1e-05, %v387_v17 }
 0x124   : > { %815 = vrsqrt.f32 %v388_v18  ;;  %vm395_vm3 = vweird.f32 %v388_v18 }
 0x12a   : > { %v816_v19 = vpop.eup %815 }
 0x12b   : > { %v390_v20 = vmul.f32 %v816_v19, %v388_v18  ;;  %vm396_vm2 = vweird.f32 %v816_v19 }
 0x12c   : > { %vm397_vm4 = vmor %vm395_vm3, %vm396_vm2 }
 0x12d   : > { %v391_v21 = vmul.f32 %v816_v19, %v390_v20 }
 0x12f   : > { %v392_v22 = vmul.f32 0.5, %v391_v21 }
 0x131   : > { %v393_v23 = vsub.f32 1.5, %v392_v22 }
 0x133   : > { %v394_v24 = vmul.f32 %v816_v19, %v393_v23 }
 0x135   : > { %v398_v26 = vsel %vm397_vm4, %v816_v19, %v394_v24 }
 0x136   : > { %v399_v27 = vmul.f32 %v398_v26, %v382_v11 }
 0x138   : > { %v403_v29 = vmul.f32 %v810_v25, %v399_v27 }
 0x13a   : > { %v407_v30 = vadd.f32 %v811_v28, %v403_v29 }
 0x13c   : > { %v408_v31 = vpack.c.bf16 %v407_v30, %v407_v30 }
 0x13e   : > { %701 = vmatmul.msk.bf16.vlgmr.msra.gmra.mxu0 %vm370_vm0, %v408_v31 }
 0x1bb   : > { %v441_v33 = vpop.f32.mrf.mxu0 }
 0x1bc   : > { %v442_v34 = vadd.f32 %v812_v32, %v441_v33 }
 0x1be   : > { %v445_v35 = vpack.c.bf16 %v442_v34, %v442_v34 }
 0x1c0   : > { %449 = vrot.lane.b32.xlu1 %v445_v35, %s1060_s20  ;;  %447 = vst.msk [vmem:[%s351_s23] sm:$0xf] %vm446_vm5, %v445_v35 }
 0x1c1   : > { %934 = shalt.err (!%p931_p0)
}
 0x1c2   : > { %722 = dma.vmem_to_hbm [thread:$0]  (%p1176_p2), %s482_s13, 64, %s484_s18, %s458_s27  }
 0x1c3   : > { %v443_v36 = vpop.f32.mrf.mxu0  ;;  %s1061_s12 = smov 64   ;;  %s494_s8 = scalar_lea.hbm %s1308_s6, %s1221_s16 }
 0x1c4   : > { %s462_s1 = sand.u32 1, %s1133_s30   ;;  %s358_s3 = scalar_lea.vmem [#allocation9], %s1218_s14 }
 0x1c5   : > { %s496_s9 = sshll.u32 %s358_s3, 4  ;;  %s498_s17 = sshll.u32 %s494_s8, 4  ;;  %s497_s9 = int_to_ptr.vmem [resolvable:$true] %s496_s9  ;;  %s499_s17 = int_to_ptr.hbm [resolvable:$true] %s498_s17 }
 0x1c6   : > { %s509_s13 = scalar_lea.hbm %s1309_s7, %s1221_s16  ;;  %s1251_s18 = scalar_lea.sflag [#allocation10], %s462_s1 }
 0x1c7   : > { %s949_s27 = sshra.s32 %s499_s17, 4  ;;  %s955_s20 = scalar_lea.hbm %s1308_s6, 8  ;;  %s950_s27 = int_to_ptr.hbm [resolvable:$true] %s949_s27 }
 0x1c8   : > { %453 = vrot.lane.b32.xlu1 %v445_v35, %s1061_s12  ;;  %s951_s12 = scalar_lea.hbm %s950_s27, 4  ;;  %p956_p10 = scmp.lt.s32.totalorder %s950_s27, %s1308_s6 }
 0x1c9   : > { %p952_p4 = scmp.ne.s32.totalorder %s950_s27, %s951_s12  ;;  %p957_p1 = scmp.lt.s32.totalorder %s955_s20, %s951_s12 }
 0x1cb   : > { %p953_p6 = pnand %p952_p4, %p1176_p2  ;;  %p958_p3 = por %p957_p1, %p956_p10 }
 0x1cd   : > { %p954_p9 = pneg %p953_p6 }
 0x1cf   : > { %p959_p7 = pnand %p958_p3, %p954_p9 }
 0x232   : > { %v450_v37 = vpop.permute.xlu1 %449 }
 0x233   : > { %452 = vst.msk [vmem:[%s358_s3] sm:$0xf] %vm446_vm5, %v450_v37 }
 0x234   : > { %962 = shalt.err (!%p959_p7)
}
 0x235   : > { %723 = dma.vmem_to_hbm [thread:$0]  (%p1176_p2), %s497_s9, 64, %s499_s17, %s1251_s18  }
 0x236   : > { %s365_s16 = scalar_lea.vmem [#allocation11], %s1218_s14  ;;  %s513_s3 = sshll.u32 %s509_s13, 4  ;;  %s514_s3 = int_to_ptr.hbm [resolvable:$true] %s513_s3 }
 0x237   : > { %s511_s1 = sshll.u32 %s365_s16, 4  ;;  %s977_s0 = sshra.s32 %s514_s3, 4  ;;  %s512_s1 = int_to_ptr.vmem [resolvable:$true] %s511_s1  ;;  %s978_s0 = int_to_ptr.hbm [resolvable:$true] %s977_s0 }
 0x238   : > { %s979_s21 = scalar_lea.hbm %s978_s0, 4  ;;  %s983_s12 = scalar_lea.hbm %s1309_s7, 8 }
 0x239   : > { %p980_p11 = scmp.ne.s32.totalorder %s978_s0, %s979_s21  ;;  %p984_p0 = scmp.lt.s32.totalorder %s978_s0, %s1309_s7 }
 0x23a   : > { %v454_v38 = vpop.permute.xlu1 %453  ;;  %p985_p4 = scmp.lt.s32.totalorder %s983_s12, %s979_s21 }
 0x23b   : > { %456 = vst.msk [vmem:[%s365_s16] sm:$0xf] %vm446_vm5, %v454_v38  ;;  %p981_p12 = pnand %p980_p11, %p1176_p2 }
 0x23c   : > { %p986_p6 = por %p985_p4, %p984_p0 }
 0x23d   : > { %p982_p13 = pneg %p981_p12 }
 0x23f   : > { %p987_p9 = pnand %p986_p6, %p982_p13 }
 0x241   : > { %990 = shalt.err (!%p987_p9)
}
 0x242   : > { %724 = dma.vmem_to_hbm [thread:$0]  (%p1176_p2), %s512_s1, 64, %s514_s3, %s1251_s18  }
 0x243 PF: > { %s525_s17 = sand.u32 1, %s1033_s24   ;;  %p740_p10 = pnand %p683_p8, %p1148_p5 }
 0x244   : > { %s526_s13 = scalar_lea.sflag [#allocation4], %s525_s17 }
 0x245   : > { %p741_p1 = pneg %p740_p10 }
 0x247   : > { %1024 = dma.done.wait (%p741_p1), %s526_s13, 64  }
 0x248   : > { %1026 = vsyncadd (%p741_p1), %s526_s13, 4294967232  ;;  %s1321_s30 = sadd.s32 4294967294, %s1053_s29  }
 0x249   : > { %s535_s23 = sand.u32 1, %s1321_s30  }
 0x24a   : > { %s536_s20 = scalar_lea.sflag [#allocation10], %s535_s23 }
 0x24b   : > { %1028 = dma.done.wait (%p741_p1), %s536_s20, 128  }
 0x24c   : > { %1030 = vsyncadd (%p741_p1), %s536_s20, 4294967168  ;;  %s28_s29 = sadd.s32 1, %s1053_s29   ;;  %s1322_s24 = smov %s1037_s25 }
 0x24d   : > { %p25_p2 = scmp.ge.s32.totalorder %s28_s29, 4   ;;  %s1323_s25 = smov %s1041_s26 }
 0x24e   : > { %s1324_s26 = smov %s1186_s19  ;;  %s1325_s27 = smov %s1049_s28 }
 0x24f   : > { %s1326_s28 = smov %s1328_s11  ;;  %27 = sbr.rel (!%p25_p2) target bundleno = 13 (0xd), region = 125 }
 0x254   :  { %552 = vsyncpa [#allocation3], 1 }
 0x255   :  { %554 = vsyncpa [#allocation3 + $0x1], 1 }
 0x256   :  { %555 = vsyncpa [#allocation6], 1 }
 0x257   :  { %556 = vsyncpa [#allocation4], 1 }
 0x258   :  { %558 = vsyncpa [#allocation4 + $0x1], 1 }
 0x259   :  { %559 = vsyncpa [#allocation10], 1 }
 0x25a   :  { %561 = vsyncpa [#allocation10 + $0x1], 1 }

</bundles_post_ra>
